<compile_context>
chip_gen: v7x
topology: tpu7x:2x2x1
jax: 0.10.0
libtpu: 0.0.40
codegen_flags: <defaults>
</compile_context>

<pallas_src>
import jax
import jax.numpy as jnp
from jax.experimental import pallas as pl
from jax.experimental.pallas import tpu as pltpu

INPUT_SIZE = 48
HIDDEN_SIZE = 200
OUTPUT_SIZE = 1

# Lane-padded sizes used inside the kernel (zero padding -> results exact).
INPUT_PAD = 128    # 48  -> 128: full-vreg, unmasked K feed into fc1
HIDDEN_PAD = 256   # 200 -> 256: one clean 256-wide MXU pass per layer
OUTPUT_PAD = 128   # 1   -> 128: lane-dense (unmasked) output stores

DEFAULT_BATCH_TILE = 1024
VMEM_LIMIT_BYTES = 48 * 1024 * 1024  # < v7x's 64 MiB physical VMEM


def _round_up(n, m):
    return ((n + m - 1) // m) * m


def mlp_kernel(x_ref,
               w1_ref, b1_ref,
               w2_ref, b2_ref,
               w3_ref, b3_ref,
               w4_ref, b4_ref,
               w5_ref, b5_ref,
               o_ref):
    """Whole forward pass fused in VMEM: 5 matmuls + bias adds + 4 ReLUs.

    MXU operands and the bias/ReLU epilogue are in the weights' dtype
    (bf16 default, f32 for the exact path); accumulation is always f32.
    """
    cdt = w1_ref.dtype

    def layer(h, w_ref, b_ref, relu):
        acc = jnp.dot(h, w_ref[...], preferred_element_type=jnp.float32)
        out = acc.astype(cdt) + b_ref[...]
        if relu:
            out = jnp.maximum(out, 0.0)
        return out

    h = layer(x_ref[...], w1_ref, b1_ref, relu=True)
    h = layer(h, w2_ref, b2_ref, relu=True)
    h = layer(h, w3_ref, b3_ref, relu=True)
    h = layer(h, w4_ref, b4_ref, relu=True)
    o_ref[...] = layer(h, w5_ref, b5_ref, relu=False).astype(o_ref.dtype)


def prepare_params(params, compute_dtype=jnp.bfloat16):
    """Pad weights/biases to MXU-friendly shapes and cast once (hoisted out of
    the per-call wrapper).  params: dict of w1..w5 (in,out), b1..b5 (1,out)."""
    cdt = jnp.dtype(compute_dtype)

    def pad_w(w, rows, cols):
        return jnp.pad(w, ((0, rows - w.shape[0]),
                           (0, cols - w.shape[1]))).astype(cdt)

    def pad_b(b, cols):
        return jnp.pad(b, ((0, 0), (0, cols - b.shape[1]))).astype(cdt)

    return (
        pad_w(params["w1"], INPUT_PAD, HIDDEN_PAD), pad_b(params["b1"], HIDDEN_PAD),
        pad_w(params["w2"], HIDDEN_PAD, HIDDEN_PAD), pad_b(params["b2"], HIDDEN_PAD),
        pad_w(params["w3"], HIDDEN_PAD, HIDDEN_PAD), pad_b(params["b3"], HIDDEN_PAD),
        pad_w(params["w4"], HIDDEN_PAD, HIDDEN_PAD), pad_b(params["b4"], HIDDEN_PAD),
        pad_w(params["w5"], HIDDEN_PAD, OUTPUT_PAD), pad_b(params["b5"], OUTPUT_PAD),
    )


def mlp_forward(x, prepared, *, batch_tile=None):
    """x: (B, INPUT_SIZE) float32.  prepared: tuple from prepare_params().
    Returns (B, OUTPUT_SIZE) float32."""
    cdt = prepared[0].dtype
    B = x.shape[0]

    # Batch tile: multiple of 16 (bf16 sublane packing), default 1024.  Small
    # batches round up to a single step; large batches get many grid steps ->
    # software pipelining of x/out DMAs + megacore sharding.
    if batch_tile is None:
        tb = min(DEFAULT_BATCH_TILE, _round_up(B, 16))
    else:
        assert batch_tile % 16 == 0, "batch_tile must be a multiple of 16"
        tb = batch_tile
    Bp = _round_up(B, tb)

    # Zero-pad batch rows and input lanes (48 -> 128); cast to compute dtype.
    xp = jnp.pad(x, ((0, Bp - B), (0, INPUT_PAD - INPUT_SIZE))).astype(cdt)

    # bf16 output on the default path halves output HBM bytes (v6e was
    # write-bound); the f32 path keeps f32 output for the exact check.
    out_dtype = jnp.float32 if cdt == jnp.dtype(jnp.float32) else cdt

    # Weights/biases are small and fully VMEM-resident at every grid step.
    def full_spec(arr):
        return pl.BlockSpec(arr.shape, lambda i: (0, 0))

    flops = 2 * Bp * (INPUT_PAD * HIDDEN_PAD
                      + 3 * HIDDEN_PAD * HIDDEN_PAD
                      + HIDDEN_PAD * OUTPUT_PAD)
    bytes_accessed = (xp.size * xp.dtype.itemsize
                      + sum(a.size * a.dtype.itemsize for a in prepared)
                      + Bp * OUTPUT_PAD * jnp.dtype(out_dtype).itemsize)

    out = pl.pallas_call(
        mlp_kernel,
        out_shape=jax.ShapeDtypeStruct((Bp, OUTPUT_PAD), out_dtype),
        grid_spec=pltpu.PrefetchScalarGridSpec(
            num_scalar_prefetch=0,
            grid=(Bp // tb,),
            in_specs=[pl.BlockSpec((tb, INPUT_PAD), lambda i: (i, 0))]
                     + [full_spec(a) for a in prepared],
            out_specs=pl.BlockSpec((tb, OUTPUT_PAD), lambda i: (i, 0)),
        ),
        compiler_params=pltpu.CompilerParams(
            dimension_semantics=("parallel",),
            vmem_limit_bytes=VMEM_LIMIT_BYTES),
        cost_estimate=pl.CostEstimate(flops=flops,
                                      transcendentals=0,
                                      bytes_accessed=bytes_accessed),
    )(xp, *prepared)

    # Strip batch padding and the lane padding of the 1-wide output.
    return out[:B, :OUTPUT_SIZE].astype(jnp.float32)


def init_params(key):
    """Deterministic synthetic params with PyTorch nn.Linear-like init
    (uniform(-1/sqrt(fan_in), 1/sqrt(fan_in))), stored as (in, out)."""
    sizes = [(INPUT_SIZE, HIDDEN_SIZE),
             (HIDDEN_SIZE, HIDDEN_SIZE),
             (HIDDEN_SIZE, HIDDEN_SIZE),
             (HIDDEN_SIZE, HIDDEN_SIZE),
             (HIDDEN_SIZE, OUTPUT_SIZE)]
    params = {}
    keys = jax.random.split(key, 2 * len(sizes))
    for idx, (fan_in, fan_out) in enumerate(sizes):
        bound = 1.0 / (fan_in ** 0.5)
        w = jax.random.uniform(keys[2 * idx], (fan_in, fan_out),
                               minval=-bound, maxval=bound, dtype=jnp.float32)
        b = jax.random.uniform(keys[2 * idx + 1], (1, fan_out),
                               minval=-bound, maxval=bound, dtype=jnp.float32)
        params[f"w{idx + 1}"] = w
        params[f"b{idx + 1}"] = b
    return params


def mlp_reference(x, params, compute_dtype=jnp.float32):
    """Plain-JAX reference mirroring the kernel's dtype convention
    (dtype-typed operands + epilogue, f32 accumulation)."""
    cdt = jnp.dtype(compute_dtype)
    h = x.astype(cdt)
    for i in range(1, 6):
        w = params[f"w{i}"].astype(cdt)
        b = params[f"b{i}"].astype(cdt)
        acc = jnp.dot(h, w, preferred_element_type=jnp.float32)
        h = acc.astype(cdt) + b
        if i < 5:
            h = jnp.maximum(h, 0.0)
    return h.astype(jnp.float32)


if __name__ == "__main__":
    key = jax.random.PRNGKey(0)
    pkey, xkey = jax.random.split(key)
    params = init_params(pkey)

    batch = 8
    x = jax.random.normal(xkey, (batch, INPUT_SIZE), dtype=jnp.float32)

    # 1) Exact-math f32 path vs. reference (tight tolerance).
    prep_f32 = prepare_params(params, jnp.float32)
    out_f32 = jax.block_until_ready(mlp_forward(x, prep_f32))
    ref_f32 = mlp_reference(x, params, jnp.float32)
    assert out_f32.shape == (batch, OUTPUT_SIZE)
    assert jnp.allclose(out_f32, ref_f32, atol=5e-4, rtol=5e-4), (
        f"f32 mismatch: {out_f32.ravel()} vs {ref_f32.ravel()}")

    # 2) Default bf16 path (bf16 MXU operands/epilogue, f32 accumulate,
    #    bf16 output) vs. matching reference.
    prep_bf16 = prepare_params(params, jnp.bfloat16)
    out_bf16 = jax.block_until_ready(mlp_forward(x, prep_bf16))
    ref_bf16 = mlp_reference(x, params, jnp.bfloat16)
    assert out_bf16.shape == (batch, OUTPUT_SIZE)
    assert jnp.allclose(out_bf16, ref_bf16, atol=2e-2, rtol=2e-2), (
        f"bf16 mismatch: {out_bf16.ravel()} vs {ref_bf16.ravel()}")

    # 3) Multi-step grid + ragged batch (exercises batch padding, pipelining
    #    and the "parallel" batch axis).
    x2 = jax.random.normal(jax.random.PRNGKey(1), (40, INPUT_SIZE),
                           dtype=jnp.float32)
    out2 = jax.block_until_ready(mlp_forward(x2, prep_f32, batch_tile=16))
    ref2 = mlp_reference(x2, params, jnp.float32)
    assert out2.shape == (40, OUTPUT_SIZE)
    assert jnp.allclose(out2, ref2, atol=5e-4, rtol=5e-4)

    print("KERNEL_OK")
</pallas_src>

<mosaic_0001>
module attributes {stable_mosaic.version = 11 : i64} {
  func.func @mlp_kernel(%arg0: i32, %arg1: memref<16x128xf32, #tpu.memory_space<vmem>>, %arg2: memref<128x256xf32, #tpu.memory_space<vmem>>, %arg3: memref<1x256xf32, #tpu.memory_space<vmem>>, %arg4: memref<256x256xf32, #tpu.memory_space<vmem>>, %arg5: memref<1x256xf32, #tpu.memory_space<vmem>>, %arg6: memref<256x256xf32, #tpu.memory_space<vmem>>, %arg7: memref<1x256xf32, #tpu.memory_space<vmem>>, %arg8: memref<256x256xf32, #tpu.memory_space<vmem>>, %arg9: memref<1x256xf32, #tpu.memory_space<vmem>>, %arg10: memref<256x128xf32, #tpu.memory_space<vmem>>, %arg11: memref<1x128xf32, #tpu.memory_space<vmem>>, %arg12: memref<16x128xf32, #tpu.memory_space<vmem>>) attributes {dimension_semantics = [#tpu.dimension_semantics<parallel>], iteration_bounds = array<i64: 1>, scalar_prefetch = 0 : i64, scratch_operands = 0 : i64, tpu.core_type = #tpu.core_type<tc>, window_params = [{transform_indices = @transform_0, window_bounds = array<i64: 16, 128>}, {pipeline_mode = #tpu.pipeline_mode<synchronous>, transform_indices = @transform_1, window_bounds = array<i64: 128, 256>}, {pipeline_mode = #tpu.pipeline_mode<synchronous>, transform_indices = @transform_2, window_bounds = array<i64: 1, 256>}, {pipeline_mode = #tpu.pipeline_mode<synchronous>, transform_indices = @transform_3, window_bounds = array<i64: 256, 256>}, {pipeline_mode = #tpu.pipeline_mode<synchronous>, transform_indices = @transform_4, window_bounds = array<i64: 1, 256>}, {pipeline_mode = #tpu.pipeline_mode<synchronous>, transform_indices = @transform_5, window_bounds = array<i64: 256, 256>}, {pipeline_mode = #tpu.pipeline_mode<synchronous>, transform_indices = @transform_6, window_bounds = array<i64: 1, 256>}, {pipeline_mode = #tpu.pipeline_mode<synchronous>, transform_indices = @transform_7, window_bounds = array<i64: 256, 256>}, {pipeline_mode = #tpu.pipeline_mode<synchronous>, transform_indices = @transform_8, window_bounds = array<i64: 1, 256>}, {pipeline_mode = #tpu.pipeline_mode<synchronous>, transform_indices = @transform_9, window_bounds = array<i64: 256, 128>}, {pipeline_mode = #tpu.pipeline_mode<synchronous>, transform_indices = @transform_10, window_bounds = array<i64: 1, 128>}, {transform_indices = @transform_11, window_bounds = array<i64: 16, 128>}]} {
    %c0 = arith.constant 0 : index
    %c0_0 = arith.constant 0 : index
    %0 = vector.load %arg1[%c0, %c0_0] : memref<16x128xf32, #tpu.memory_space<vmem>>, vector<16x128xf32>
    %c0_1 = arith.constant 0 : index
    %c0_2 = arith.constant 0 : index
    %1 = vector.load %arg2[%c0_1, %c0_2] : memref<128x256xf32, #tpu.memory_space<vmem>>, vector<128x256xf32>
    %cst = arith.constant dense<0.000000e+00> : vector<16x256xf32>
    %2 = tpu.matmul %0, %1, %cst {dimension_numbers = #tpu.dot_dimension_numbers<[1], [0], [0], [1], [0, 0, 1, 1], [], []>} : vector<16x128xf32>, vector<128x256xf32>, vector<16x256xf32> -> vector<16x256xf32>
    %c0_3 = arith.constant 0 : index
    %c0_4 = arith.constant 0 : index
    %3 = vector.load %arg3[%c0_3, %c0_4] : memref<1x256xf32, #tpu.memory_space<vmem>>, vector<1x256xf32>
    %4 = vector.broadcast %3 : vector<1x256xf32> to vector<16x256xf32>
    %5 = arith.addf %2, %4 : vector<16x256xf32>
    %cst_5 = arith.constant 0.000000e+00 : f32
    %6 = vector.broadcast %cst_5 : f32 to vector<16x256xf32>
    %7 = arith.maximumf %5, %6 : vector<16x256xf32>
    %c0_6 = arith.constant 0 : index
    %c0_7 = arith.constant 0 : index
    %8 = vector.load %arg4[%c0_6, %c0_7] : memref<256x256xf32, #tpu.memory_space<vmem>>, vector<256x256xf32>
    %cst_8 = arith.constant dense<0.000000e+00> : vector<16x256xf32>
    %9 = tpu.matmul %7, %8, %cst_8 {dimension_numbers = #tpu.dot_dimension_numbers<[1], [0], [0], [1], [0, 0, 1, 1], [], []>} : vector<16x256xf32>, vector<256x256xf32>, vector<16x256xf32> -> vector<16x256xf32>
    %c0_9 = arith.constant 0 : index
    %c0_10 = arith.constant 0 : index
    %10 = vector.load %arg5[%c0_9, %c0_10] : memref<1x256xf32, #tpu.memory_space<vmem>>, vector<1x256xf32>
    %11 = vector.broadcast %10 : vector<1x256xf32> to vector<16x256xf32>
    %12 = arith.addf %9, %11 : vector<16x256xf32>
    %cst_11 = arith.constant 0.000000e+00 : f32
    %13 = vector.broadcast %cst_11 : f32 to vector<16x256xf32>
    %14 = arith.maximumf %12, %13 : vector<16x256xf32>
    %c0_12 = arith.constant 0 : index
    %c0_13 = arith.constant 0 : index
    %15 = vector.load %arg6[%c0_12, %c0_13] : memref<256x256xf32, #tpu.memory_space<vmem>>, vector<256x256xf32>
    %cst_14 = arith.constant dense<0.000000e+00> : vector<16x256xf32>
    %16 = tpu.matmul %14, %15, %cst_14 {dimension_numbers = #tpu.dot_dimension_numbers<[1], [0], [0], [1], [0, 0, 1, 1], [], []>} : vector<16x256xf32>, vector<256x256xf32>, vector<16x256xf32> -> vector<16x256xf32>
    %c0_15 = arith.constant 0 : index
    %c0_16 = arith.constant 0 : index
    %17 = vector.load %arg7[%c0_15, %c0_16] : memref<1x256xf32, #tpu.memory_space<vmem>>, vector<1x256xf32>
    %18 = vector.broadcast %17 : vector<1x256xf32> to vector<16x256xf32>
    %19 = arith.addf %16, %18 : vector<16x256xf32>
    %cst_17 = arith.constant 0.000000e+00 : f32
    %20 = vector.broadcast %cst_17 : f32 to vector<16x256xf32>
    %21 = arith.maximumf %19, %20 : vector<16x256xf32>
    %c0_18 = arith.constant 0 : index
    %c0_19 = arith.constant 0 : index
    %22 = vector.load %arg8[%c0_18, %c0_19] : memref<256x256xf32, #tpu.memory_space<vmem>>, vector<256x256xf32>
    %cst_20 = arith.constant dense<0.000000e+00> : vector<16x256xf32>
    %23 = tpu.matmul %21, %22, %cst_20 {dimension_numbers = #tpu.dot_dimension_numbers<[1], [0], [0], [1], [0, 0, 1, 1], [], []>} : vector<16x256xf32>, vector<256x256xf32>, vector<16x256xf32> -> vector<16x256xf32>
    %c0_21 = arith.constant 0 : index
    %c0_22 = arith.constant 0 : index
    %24 = vector.load %arg9[%c0_21, %c0_22] : memref<1x256xf32, #tpu.memory_space<vmem>>, vector<1x256xf32>
    %25 = vector.broadcast %24 : vector<1x256xf32> to vector<16x256xf32>
    %26 = arith.addf %23, %25 : vector<16x256xf32>
    %cst_23 = arith.constant 0.000000e+00 : f32
    %27 = vector.broadcast %cst_23 : f32 to vector<16x256xf32>
    %28 = arith.maximumf %26, %27 : vector<16x256xf32>
    %c0_24 = arith.constant 0 : index
    %c0_25 = arith.constant 0 : index
    %29 = vector.load %arg10[%c0_24, %c0_25] : memref<256x128xf32, #tpu.memory_space<vmem>>, vector<256x128xf32>
    %cst_26 = arith.constant dense<0.000000e+00> : vector<16x128xf32>
    %30 = tpu.matmul %28, %29, %cst_26 {dimension_numbers = #tpu.dot_dimension_numbers<[1], [0], [0], [1], [0, 0, 1, 1], [], []>} : vector<16x256xf32>, vector<256x128xf32>, vector<16x128xf32> -> vector<16x128xf32>
    %c0_27 = arith.constant 0 : index
    %c0_28 = arith.constant 0 : index
    %31 = vector.load %arg11[%c0_27, %c0_28] : memref<1x128xf32, #tpu.memory_space<vmem>>, vector<1x128xf32>
    %32 = vector.broadcast %31 : vector<1x128xf32> to vector<16x128xf32>
    %33 = arith.addf %30, %32 : vector<16x128xf32>
    %c0_29 = arith.constant 0 : index
    %c0_30 = arith.constant 0 : index
    %34 = vector.load %arg12[%c0_29, %c0_30] : memref<16x128xf32, #tpu.memory_space<vmem>>, vector<16x128xf32>
    tpu.vector_store %arg12[%c0_29, %c0_30], %33 {strides = array<i32>} : memref<16x128xf32, #tpu.memory_space<vmem>>, vector<16x128xf32>,
    return
  }
  func.func @transform_0(%arg0: i32) -> (i32, i32) {
    %c0_i32 = arith.constant 0 : i32
    %c0_i32_0 = arith.constant 0 : i32
    return %arg0, %c0_i32 : i32, i32
  }
  func.func @transform_1(%arg0: i32) -> (i32, i32) {
    %c0_i32 = arith.constant 0 : i32
    %c0_i32_0 = arith.constant 0 : i32
    %c0_i32_1 = arith.constant 0 : i32
    return %c0_i32, %c0_i32_0 : i32, i32
  }
  func.func @transform_2(%arg0: i32) -> (i32, i32) {
    %c0_i32 = arith.constant 0 : i32
    %c0_i32_0 = arith.constant 0 : i32
    %c0_i32_1 = arith.constant 0 : i32
    return %c0_i32, %c0_i32_0 : i32, i32
  }
  func.func @transform_3(%arg0: i32) -> (i32, i32) {
    %c0_i32 = arith.constant 0 : i32
    %c0_i32_0 = arith.constant 0 : i32
    %c0_i32_1 = arith.constant 0 : i32
    return %c0_i32, %c0_i32_0 : i32, i32
  }
  func.func @transform_4(%arg0: i32) -> (i32, i32) {
    %c0_i32 = arith.constant 0 : i32
    %c0_i32_0 = arith.constant 0 : i32
    %c0_i32_1 = arith.constant 0 : i32
    return %c0_i32, %c0_i32_0 : i32, i32
  }
  func.func @transform_5(%arg0: i32) -> (i32, i32) {
    %c0_i32 = arith.constant 0 : i32
    %c0_i32_0 = arith.constant 0 : i32
    %c0_i32_1 = arith.constant 0 : i32
    return %c0_i32, %c0_i32_0 : i32, i32
  }
  func.func @transform_6(%arg0: i32) -> (i32, i32) {
    %c0_i32 = arith.constant 0 : i32
    %c0_i32_0 = arith.constant 0 : i32
    %c0_i32_1 = arith.constant 0 : i32
    return %c0_i32, %c0_i32_0 : i32, i32
  }
  func.func @transform_7(%arg0: i32) -> (i32, i32) {
    %c0_i32 = arith.constant 0 : i32
    %c0_i32_0 = arith.constant 0 : i32
    %c0_i32_1 = arith.constant 0 : i32
    return %c0_i32, %c0_i32_0 : i32, i32
  }
  func.func @transform_8(%arg0: i32) -> (i32, i32) {
    %c0_i32 = arith.constant 0 : i32
    %c0_i32_0 = arith.constant 0 : i32
    %c0_i32_1 = arith.constant 0 : i32
    return %c0_i32, %c0_i32_0 : i32, i32
  }
  func.func @transform_9(%arg0: i32) -> (i32, i32) {
    %c0_i32 = arith.constant 0 : i32
    %c0_i32_0 = arith.constant 0 : i32
    %c0_i32_1 = arith.constant 0 : i32
    return %c0_i32, %c0_i32_0 : i32, i32
  }
  func.func @transform_10(%arg0: i32) -> (i32, i32) {
    %c0_i32 = arith.constant 0 : i32
    %c0_i32_0 = arith.constant 0 : i32
    %c0_i32_1 = arith.constant 0 : i32
    return %c0_i32, %c0_i32_0 : i32, i32
  }
  func.func @transform_11(%arg0: i32) -> (i32, i32) {
    %c0_i32 = arith.constant 0 : i32
    %c0_i32_0 = arith.constant 0 : i32
    return %arg0, %c0_i32 : i32, i32
  }
}

</mosaic_0001>

<bundles_post_ra>
// kernel: tpu_custom_call.1
= control target key start
LH: loop header
LB: loop body
LE: loop exit
PB: predicated region body
PF: predicated region fallthrough
CT: control target
= control target key end

     0   :  { %16 = vsyncpa [#allocation3], 0  ;;  %s1532_s0 = inlined_call_operand.hbm [shape: f32[16,128], index: 0, kind: input, shape index: {}]   ;;  %s1533_s1 = inlined_call_operand.hbm [shape: f32[128,256], index: 1, kind: input, shape index: {}]   ;;  %s1534_s2 = inlined_call_operand.vmem [shape: f32[1,256], index: 2, kind: input, shape index: {}]   ;;  %s1535_s3 = inlined_call_operand.hbm [shape: f32[256,256], index: 3, kind: input, shape index: {}]   ;;  %s1536_s4 = inlined_call_operand.vmem [shape: f32[1,256], index: 4, kind: input, shape index: {}]   ;;  %s1537_s5 = inlined_call_operand.hbm [shape: f32[256,256], index: 5, kind: input, shape index: {}]   ;;  %s1538_s6 = inlined_call_operand.vmem [shape: f32[1,256], index: 6, kind: input, shape index: {}]   ;;  %s1539_s7 = inlined_call_operand.hbm [shape: f32[256,256], index: 7, kind: input, shape index: {}]   ;;  %s1540_s8 = inlined_call_operand.vmem [shape: f32[1,256], index: 8, kind: input, shape index: {}]   ;;  %s1541_s9 = inlined_call_operand.hbm [shape: f32[256,128], index: 9, kind: input, shape index: {}]   ;;  %s1542_s10 = inlined_call_operand.vmem [shape: f32[1,128], index: 10, kind: input, shape index: {}]   ;;  %s1543_s11 = inlined_call_operand.hbm [shape: f32[16,128], index: 11, kind: output, shape index: {}]  }
   0x1   :  { %17 = vsyncpa [#allocation6], 0 }
   0x2   :  { %18 = vsyncpa [#allocation9], 0 }
   0x3   :  { %19 = vsyncpa [#allocation12], 0 }
   0x4   :  { %20 = vsyncpa [#allocation4], 0  ;;  %s1326_s17 = smov [#allocation5]   ;;  %s1162_s21 = scalar_lea.hbm %s1533_s1, 4096 }
   0x5   :  { %s38_s18 = sshll.u32 %s1326_s17, 4  ;;  %p1163_p0 = scmp.ne.s32.totalorder %s1533_s1, %s1162_s21  ;;  %s39_s18 = int_to_ptr.vmem [resolvable:$true] %s38_s18 }
   0x6   :  { %p1166_p1 = scmp.lt.u32.totalorder %s1162_s21, %s1533_s1 }
   0x8   :  { %p1168_p2 = pnand %p1166_p1, %p1163_p0 }
   0xa   :  { %1171 = shalt.err (!%p1168_p2)
}
   0xb   :  { %s1172_s26 = scalar_lea.vmem %s39_s18, 4096  ;;  %p1177_p4 = scmp.lt.s32.totalorder %s39_s18, %s39_s18 }
   0xc   :  { %p1173_p3 = scmp.ne.s32.totalorder %s39_s18, %s1172_s26  ;;  %p1178_p5 = scmp.lt.s32.totalorder %s1172_s26, %s1172_s26 }
   0xe   :  { %p1179_p6 = por %p1178_p5, %p1177_p4 }
  0x10   :  { %p1180_p7 = pnand %p1179_p6, %p1173_p3 }
  0x12   :  { %1183 = shalt.err (!%p1180_p7)
}
  0x13   :  { %s1327_s27 = smov 256   ;;  %s1328_s28 = smov 16  }
  0x14   :  { %44 = dma.hbm_to_vmem [thread:$0]  %s1533_s1, 4096, %s39_s18, [#allocation6], %s1327_s27, %s1327_s27, %s1328_s28  }
  0x15   :  { %s1329_s12 = smov [#allocation8]   ;;  %s1330_s14 = smov [#allocation2]  }
  0x16   :  { %s66_s13 = sshll.u32 %s1329_s12, 4  ;;  %s26_s15 = sshll.u32 %s1330_s14, 4  ;;  %s67_s13 = int_to_ptr.vmem [resolvable:$true] %s66_s13  ;;  %s27_s15 = int_to_ptr.vmem [resolvable:$true] %s26_s15 }
  0x17   :  { %s1184_s19 = scalar_lea.hbm %s1537_s5, 8192 }
  0x18   :  { %p1185_p8 = scmp.ne.s32.totalorder %s1537_s5, %s1184_s19  ;;  %p1188_p9 = scmp.lt.u32.totalorder %s1184_s19, %s1537_s5 }
  0x1a   :  { %p1190_p10 = pnand %p1188_p9, %p1185_p8 }
  0x1c   :  { %1193 = shalt.err (!%p1190_p10)
}
  0x1d   :  { %s1194_s1 = scalar_lea.vmem %s67_s13, 8192  ;;  %p1199_p12 = scmp.lt.s32.totalorder %s67_s13, %s67_s13 }
  0x1e   :  { %p1195_p11 = scmp.ne.s32.totalorder %s67_s13, %s1194_s1  ;;  %p1200_p13 = scmp.lt.s32.totalorder %s1194_s1, %s1194_s1 }
  0x20   :  { %p1201_p0 = por %p1200_p13, %p1199_p12 }
  0x22   :  { %p1202_p1 = pnand %p1201_p0, %p1195_p11 }
  0x24   :  { %1205 = shalt.err (!%p1202_p1)
}
  0x25   :  { %72 = dma.hbm_to_vmem [thread:$0]  %s1537_s5, 8192, %s67_s13, [#allocation9], %s1327_s27, %s1327_s27, %s1328_s28  }
  0x26   :  { %s1206_s29 = scalar_lea.hbm %s1532_s0, 256 }
  0x27   :  { %p1207_p2 = scmp.ne.s32.totalorder %s1532_s0, %s1206_s29  ;;  %p1210_p3 = scmp.lt.u32.totalorder %s1206_s29, %s1532_s0 }
  0x29   :  { %p1212_p4 = pnand %p1210_p3, %p1207_p2 }
  0x2b   :  { %1215 = shalt.err (!%p1212_p4)
}
  0x2c   :  { %s1216_s17 = scalar_lea.vmem %s27_s15, 256  ;;  %p1221_p6 = scmp.lt.s32.totalorder %s27_s15, %s27_s15 }
  0x2d   :  { %p1217_p5 = scmp.ne.s32.totalorder %s27_s15, %s1216_s17  ;;  %p1222_p7 = scmp.lt.s32.totalorder %s1216_s17, %s1216_s17 }
  0x2f   :  { %p1223_p8 = por %p1222_p7, %p1221_p6 }
  0x31   :  { %p1224_p9 = pnand %p1223_p8, %p1217_p5 }
  0x33   :  { %1227 = shalt.err (!%p1224_p9)
}
  0x34   :  { %s1331_s5 = smov 128   ;;  %s1332_s13 = smov 8  }
  0x35   :  { %32 = dma.hbm_to_vmem [thread:$0]  %s1532_s0, 256, %s27_s15, [#allocation3], %s1331_s5, %s1331_s5, %s1332_s13  }
  0x36   :  { %s1333_s21 = smov [#allocation7]   ;;  %s1334_s23 = smov [#allocation10]  }
  0x37   :  { %s52_s22 = sshll.u32 %s1333_s21, 4  ;;  %s80_s1 = sshll.u32 %s1334_s23, 4  ;;  %s53_s22 = int_to_ptr.vmem [resolvable:$true] %s52_s22  ;;  %s81_s1 = int_to_ptr.vmem [resolvable:$true] %s80_s1 }
  0x38   :  { %s1228_s25 = scalar_lea.hbm %s1535_s3, 8192 }
  0x39   :  { %p1229_p10 = scmp.ne.s32.totalorder %s1535_s3, %s1228_s25  ;;  %p1232_p11 = scmp.lt.u32.totalorder %s1228_s25, %s1535_s3 }
  0x3b   :  { %p1234_p12 = pnand %p1232_p11, %p1229_p10 }
  0x3d   :  { %1237 = shalt.err (!%p1234_p12)
}
  0x3e   :  { %s1238_s0 = scalar_lea.vmem %s53_s22, 8192  ;;  %p1243_p0 = scmp.lt.s32.totalorder %s53_s22, %s53_s22 }
  0x3f   :  { %p1239_p13 = scmp.ne.s32.totalorder %s53_s22, %s1238_s0  ;;  %p1244_p1 = scmp.lt.s32.totalorder %s1238_s0, %s1238_s0 }
  0x41   :  { %p1245_p2 = por %p1244_p1, %p1243_p0 }
  0x43   :  { %p1246_p3 = pnand %p1245_p2, %p1239_p13 }
  0x45   :  { %1249 = shalt.err (!%p1246_p3)
}
  0x46   :  { %58 = dma.hbm_to_vmem [thread:$0]  %s1535_s3, 8192, %s53_s22, [#allocation6], %s1327_s27, %s1327_s27, %s1328_s28  }
  0x47   :  { %s1250_s19 = scalar_lea.hbm %s1539_s7, 8192 }
  0x48   :  { %p1251_p4 = scmp.ne.s32.totalorder %s1539_s7, %s1250_s19  ;;  %p1254_p5 = scmp.lt.u32.totalorder %s1250_s19, %s1539_s7 }
  0x4a   :  { %p1256_p6 = pnand %p1254_p5, %p1251_p4 }
  0x4c   :  { %1259 = shalt.err (!%p1256_p6)
}
  0x4d   :  { %s1260_s24 = scalar_lea.vmem %s81_s1, 8192  ;;  %p1265_p8 = scmp.lt.s32.totalorder %s81_s1, %s81_s1 }
  0x4e   :  { %p1261_p7 = scmp.ne.s32.totalorder %s81_s1, %s1260_s24  ;;  %p1266_p9 = scmp.lt.s32.totalorder %s1260_s24, %s1260_s24 }
  0x50   :  { %p1267_p10 = por %p1266_p9, %p1265_p8 }
  0x52   :  { %p1268_p11 = pnand %p1267_p10, %p1261_p7 }
  0x54   :  { %1271 = shalt.err (!%p1268_p11)
}
  0x55   :  { %86 = dma.hbm_to_vmem [thread:$0]  %s1539_s7, 8192, %s81_s1, [#allocation9], %s1327_s27, %s1327_s27, %s1328_s28  }
  0x56   :  { %s1335_s25 = smov [#allocation11]   ;;  %s1272_s12 = scalar_lea.hbm %s1541_s9, 4096 }
  0x57   :  { %s94_s26 = sshll.u32 %s1335_s25, 4  ;;  %p1273_p12 = scmp.ne.s32.totalorder %s1541_s9, %s1272_s12  ;;  %s95_s26 = int_to_ptr.vmem [resolvable:$true] %s94_s26 }
  0x58   :  { %p1276_p13 = scmp.lt.u32.totalorder %s1272_s12, %s1541_s9 }
  0x5a   :  { %p1278_p0 = pnand %p1276_p13, %p1273_p12 }
  0x5c   :  { %1281 = shalt.err (!%p1278_p0)
}
  0x5d   :  { %s1282_s17 = scalar_lea.vmem %s95_s26, 4096  ;;  %p1287_p2 = scmp.lt.s32.totalorder %s95_s26, %s95_s26 }
  0x5e   :  { %p1283_p1 = scmp.ne.s32.totalorder %s95_s26, %s1282_s17  ;;  %p1288_p3 = scmp.lt.s32.totalorder %s1282_s17, %s1282_s17 }
  0x60   :  { %p1289_p4 = por %p1288_p3, %p1287_p2 }
  0x62   :  { %p1290_p5 = pnand %p1289_p4, %p1283_p1 }
  0x64   :  { %1293 = shalt.err (!%p1290_p5)
}
  0x65   :  { %100 = dma.hbm_to_vmem [thread:$0]  %s1541_s9, 4096, %s95_s26, [#allocation12], %s1331_s5, %s1331_s5, %s1332_s13  }
  0x66   :  { %1316 = dma.done.wait [#allocation3], 256  }
  0x67   :  { %1317 = vsyncadd [#allocation3], 4294967040 }
  0x68   :  { %1318 = dma.done.wait [#allocation6], 12288  }
  0x69   :  { %1319 = vsyncadd [#allocation6], 4294955008 }
  0x6a   :  { %1320 = dma.done.wait [#allocation9], 16384  }
  0x6b   :  { %1321 = vsyncadd [#allocation9], 4294950912 }
  0x6c   :  { %1322 = dma.done.wait [#allocation12], 4096  }
  0x6d   :  { %1323 = vsyncadd [#allocation12], 4294963200  ;;  %v1336_v0 = vmov 0.0   ;;  %v124_v1 = vld [vmem:[#allocation5 + $0x8] sm:$0xff]  ;;  %v126_v2 = vld [vmem:[#allocation5 + $0x18] sm:$0xff]  ;;  %s1337_s23 = smov [#allocation13]  }
  0x6e   :  { %231 = vmatprep.mubr.f32.mxu0 %v1336_v0  ;;  %v123_v3 = vld [vmem:[#allocation5] sm:$0xff]  ;;  %v894_v4 = vpack.c.bf16 %v126_v2, %v124_v1  ;;  %v125_v5 = vld [vmem:[#allocation5 + $0x10] sm:$0xff]  ;;  %v128_v6 = vld [vmem:[#allocation5 + $0x28] sm:$0xff]  ;;  %s840_s18 = sshll.u32 %s1337_s23, 4  ;;  %s841_s18 = int_to_ptr.vmem [resolvable:$true] %s840_s18 }
  0x6f   :  { %v130_v7 = vld [vmem:[#allocation5 + $0x38] sm:$0xff]  ;;  %v896_v8 = vpack.c.bf16 %v125_v5, %v123_v3  ;;  %v127_v10 = vld [vmem:[#allocation5 + $0x20] sm:$0xff]  ;;  %v129_v11 = vld [vmem:[#allocation5 + $0x30] sm:$0xff]  ;;  %s1294_s24 = scalar_lea.vmem %s841_s18, 256  ;;  %p1299_p7 = scmp.lt.s32.totalorder %s841_s18, %s841_s18 }
  0x70   :  { %v898_v9 = vpack.c.bf16 %v130_v7, %v128_v6  ;;  %v132_v12 = vld [vmem:[#allocation5 + $0x48] sm:$0xff]  ;;  %895 = vmatprep.subr.bf16.mxu0 %v894_v4  ;;  %v134_v13 = vld [vmem:[#allocation5 + $0x58] sm:$0xff]  ;;  %v900_v14 = vpack.c.bf16 %v129_v11, %v127_v10  ;;  %v131_v16 = vld [vmem:[#allocation5 + $0x40] sm:$0xff]  ;;  %p1295_p6 = scmp.ne.s32.totalorder %s841_s18, %s1294_s24  ;;  %p1300_p8 = scmp.lt.s32.totalorder %s1294_s24, %s1294_s24 }
  0x71   :  { %897 = vmatpush1.bf16.msra.mxu0 %v896_v8  ;;  %v902_v15 = vpack.c.bf16 %v134_v13, %v132_v12  ;;  %v133_v17 = vld [vmem:[#allocation5 + $0x50] sm:$0xff]  ;;  %v136_v18 = vld [vmem:[#allocation5 + $0x68] sm:$0xff]  ;;  %v138_v19 = vld [vmem:[#allocation5 + $0x78] sm:$0xff] }
  0x72   :  { %899 = vmatprep.subr.bf16.mxu0 %v898_v9  ;;  %v904_v20 = vpack.c.bf16 %v133_v17, %v131_v16  ;;  %v906_v21 = vpack.c.bf16 %v138_v19, %v136_v18  ;;  %v135_v22 = vld [vmem:[#allocation5 + $0x60] sm:$0xff]  ;;  %v137_v23 = vld [vmem:[#allocation5 + $0x70] sm:$0xff]  ;;  %v140_v24 = vld [vmem:[#allocation5 + $0x88] sm:$0xff]  ;;  %p1301_p9 = por %p1300_p8, %p1299_p7 }
  0x73   :  { %v142_v25 = vld [vmem:[#allocation5 + $0x98] sm:$0xff]  ;;  %v139_v26 = vld [vmem:[#allocation5 + $0x80] sm:$0xff]  ;;  %v141_v27 = vld [vmem:[#allocation5 + $0x90] sm:$0xff]  ;;  %v908_v30 = vpack.c.bf16 %v137_v23, %v135_v22 }
  0x74   :  { %v249_v28 = vld [vmem:[#allocation7 + $0x8] sm:$0xff]  ;;  %v251_v29 = vld [vmem:[#allocation7 + $0x18] sm:$0xff]  ;;  %v248_v33 = vld [vmem:[#allocation7] sm:$0xff]  ;;  %v910_v36 = vpack.c.bf16 %v142_v25, %v140_v24  ;;  %v912_v46 = vpack.c.bf16 %v141_v27, %v139_v26  ;;  %p1302_p10 = pnand %p1301_p9, %p1295_p6 }
  0x75   :  { %901 = vmatpush1.bf16.msra.mxu0 %v900_v14  ;;  %v144_v31 = vld [vmem:[#allocation5 + $0xa8] sm:$0xff]  ;;  %v926_v32 = vpack.c.bf16 %v251_v29, %v249_v28  ;;  %v250_v34 = vld [vmem:[#allocation7 + $0x10] sm:$0xff]  ;;  %v255_v38 = vld [vmem:[#allocation7 + $0x38] sm:$0xff] }
  0x76   :  { %903 = vmatprep.subr.bf16.mxu0 %v902_v15  ;;  %v253_v35 = vld [vmem:[#allocation7 + $0x28] sm:$0xff]  ;;  %v928_v37 = vpack.c.bf16 %v250_v34, %v248_v33  ;;  %v252_v39 = vld [vmem:[#allocation7 + $0x20] sm:$0xff]  ;;  %v254_v40 = vld [vmem:[#allocation7 + $0x30] sm:$0xff] }
  0x77   :  { %v146_v41 = vld [vmem:[#allocation5 + $0xb8] sm:$0xff]  ;;  %927 = vmatprep.subr.bf16.mxu1 %v926_v32  ;;  %v930_v42 = vpack.c.bf16 %v255_v38, %v253_v35  ;;  %v257_v43 = vld [vmem:[#allocation7 + $0x48] sm:$0xff]  ;;  %v932_v45 = vpack.c.bf16 %v254_v40, %v252_v39  ;;  %v143_v47 = vld [vmem:[#allocation5 + $0xa0] sm:$0xff] }
  0x78   :  { %v259_v44 = vld [vmem:[#allocation7 + $0x58] sm:$0xff]  ;;  %929 = vmatpush1.bf16.msra.mxu1 %v928_v37  ;;  %v256_v49 = vld [vmem:[#allocation7 + $0x40] sm:$0xff]  ;;  %v258_v50 = vld [vmem:[#allocation7 + $0x50] sm:$0xff]  ;;  %v914_v51 = vpack.c.bf16 %v146_v41, %v144_v31 }
  0x79   :  { %905 = vmatpush1.bf16.msra.mxu0 %v904_v20  ;;  %931 = vmatprep.subr.bf16.mxu1 %v930_v42  ;;  %v934_v48 = vpack.c.bf16 %v259_v44, %v257_v43  ;;  %v145_v52 = vld [vmem:[#allocation5 + $0xb0] sm:$0xff]  ;;  %v261_v53 = vld [vmem:[#allocation7 + $0x68] sm:$0xff]  ;;  %v263_v54 = vld [vmem:[#allocation7 + $0x78] sm:$0xff]  ;;  %v936_v57 = vpack.c.bf16 %v258_v50, %v256_v49 }
  0x7a   :  { %907 = vmatprep.subr.bf16.mxu0 %v906_v21  ;;  %v148_v55 = vld [vmem:[#allocation5 + $0xc8] sm:$0xff]  ;;  %v150_v56 = vld [vmem:[#allocation5 + $0xd8] sm:$0xff]  ;;  %v916_v58 = vpack.c.bf16 %v145_v52, %v143_v47  ;;  %v147_v59 = vld [vmem:[#allocation5 + $0xc0] sm:$0xff]  ;;  %v938_v60 = vpack.c.bf16 %v263_v54, %v261_v53 }
  0x7b   :  { %v260_v61 = vld [vmem:[#allocation7 + $0x60] sm:$0xff]  ;;  %v262_v62 = vld [vmem:[#allocation7 + $0x70] sm:$0xff]  ;;  %v918_v63 = vpack.c.bf16 %v150_v56, %v148_v55  ;;  %v265_v2 = vld [vmem:[#allocation7 + $0x88] sm:$0xff] }
  0x7c   :  { %933 = vmatpush1.bf16.msra.mxu1 %v932_v45  ;;  %v149_v1 = vld [vmem:[#allocation5 + $0xd0] sm:$0xff]  ;;  %v267_v3 = vld [vmem:[#allocation7 + $0x98] sm:$0xff]  ;;  %v152_v4 = vld [vmem:[#allocation5 + $0xe8] sm:$0xff]  ;;  %v940_v6 = vpack.c.bf16 %v262_v62, %v260_v61 }
  0x7d   :  { %909 = vmatpush1.bf16.msra.mxu0 %v908_v30  ;;  %935 = vmatprep.subr.bf16.mxu1 %v934_v48  ;;  %v154_v5 = vld [vmem:[#allocation5 + $0xf8] sm:$0xff]  ;;  %v920_v7 = vpack.c.bf16 %v149_v1, %v147_v59  ;;  %v151_v8 = vld [vmem:[#allocation5 + $0xe0] sm:$0xff]  ;;  %v942_v9 = vpack.c.bf16 %v267_v3, %v265_v2  ;;  %v266_v11 = vld [vmem:[#allocation7 + $0x90] sm:$0xff] }
  0x7e   :  { %911 = vmatprep.subr.bf16.mxu0 %v910_v36  ;;  %v264_v10 = vld [vmem:[#allocation7 + $0x80] sm:$0xff]  ;;  %v922_v12 = vpack.c.bf16 %v154_v5, %v152_v4  ;;  %v153_v13 = vld [vmem:[#allocation5 + $0xf0] sm:$0xff]  ;;  %v269_v14 = vld [vmem:[#allocation7 + $0xa8] sm:$0xff] }
  0x7f   :  { %v271_v15 = vld [vmem:[#allocation7 + $0xb8] sm:$0xff]  ;;  %v944_v16 = vpack.c.bf16 %v266_v11, %v264_v10  ;;  %v924_v17 = vpack.c.bf16 %v153_v13, %v151_v8  ;;  %v268_v19 = vld [vmem:[#allocation7 + $0xa0] sm:$0xff]  ;;  %v270_v20 = vld [vmem:[#allocation7 + $0xb0] sm:$0xff] }
  0x80   :  { %937 = vmatpush1.bf16.msra.mxu1 %v936_v57  ;;  %v946_v18 = vpack.c.bf16 %v271_v15, %v269_v14  ;;  %v273_v21 = vld [vmem:[#allocation7 + $0xc8] sm:$0xff]  ;;  %v275_v22 = vld [vmem:[#allocation7 + $0xd8] sm:$0xff]  ;;  %v948_v23 = vpack.c.bf16 %v270_v20, %v268_v19  ;;  %v121_v24 = vld [vmem:[#allocation2] sm:$0xff] }
  0x81   :  { %913 = vmatpush1.bf16.msra.mxu0 %v912_v46  ;;  %939 = vmatprep.subr.bf16.mxu1 %v938_v60  ;;  %v950_v25 = vpack.c.bf16 %v275_v22, %v273_v21  ;;  %v272_v26 = vld [vmem:[#allocation7 + $0xc0] sm:$0xff]  ;;  %v274_v27 = vld [vmem:[#allocation7 + $0xd0] sm:$0xff]  ;;  %v277_v28 = vld [vmem:[#allocation7 + $0xe8] sm:$0xff] }
  0x82   :  { %915 = vmatprep.subr.bf16.mxu0 %v914_v51  ;;  %v279_v29 = vld [vmem:[#allocation7 + $0xf8] sm:$0xff]  ;;  %v952_v30 = vpack.c.bf16 %v274_v27, %v272_v26  ;;  %v276_v33 = vld [vmem:[#allocation7 + $0xe0] sm:$0xff]  ;;  %v278_v34 = vld [vmem:[#allocation7 + $0xf0] sm:$0xff] }
  0x83   :  { %v122_v31 = vld [vmem:[#allocation2 + $0x8] sm:$0xff]  ;;  %v954_v32 = vpack.c.bf16 %v279_v29, %v277_v28  ;;  %v281_v35 = vld [vmem:[#allocation7 + $0x108] sm:$0xff]  ;;  %v956_v37 = vpack.c.bf16 %v278_v34, %v276_v33  ;;  %v280_v39 = vld [vmem:[#allocation7 + $0x100] sm:$0xff] }
  0x84   :  { %941 = vmatpush1.bf16.msra.mxu1 %v940_v6  ;;  %v283_v36 = vld [vmem:[#allocation7 + $0x118] sm:$0xff]  ;;  %v282_v40 = vld [vmem:[#allocation7 + $0x110] sm:$0xff]  ;;  %v285_v41 = vld [vmem:[#allocation7 + $0x128] sm:$0xff] }
  0x85   :  { %917 = vmatpush1.bf16.msra.mxu0 %v916_v58  ;;  %943 = vmatprep.subr.bf16.mxu1 %v942_v9  ;;  %v958_v38 = vpack.c.bf16 %v283_v36, %v281_v35  ;;  %v287_v42 = vld [vmem:[#allocation7 + $0x138] sm:$0xff]  ;;  %v960_v43 = vpack.c.bf16 %v282_v40, %v280_v39  ;;  %v284_v44 = vld [vmem:[#allocation7 + $0x120] sm:$0xff]  ;;  %v286_v45 = vld [vmem:[#allocation7 + $0x130] sm:$0xff] }
  0x86   :  { %919 = vmatprep.subr.bf16.mxu0 %v918_v63  ;;  %v289_v46 = vld [vmem:[#allocation7 + $0x148] sm:$0xff]  ;;  %v291_v47 = vld [vmem:[#allocation7 + $0x158] sm:$0xff]  ;;  %v964_v48 = vpack.c.bf16 %v286_v45, %v284_v44  ;;  %v288_v50 = vld [vmem:[#allocation7 + $0x140] sm:$0xff] }
  0x87   :  { %v966_v49 = vpack.c.bf16 %v291_v47, %v289_v46  ;;  %v290_v51 = vld [vmem:[#allocation7 + $0x150] sm:$0xff]  ;;  %v293_v52 = vld [vmem:[#allocation7 + $0x168] sm:$0xff]  ;;  %v295_v53 = vld [vmem:[#allocation7 + $0x178] sm:$0xff] }
  0x88   :  { %945 = vmatpush1.bf16.msra.mxu1 %v944_v16  ;;  %v968_v54 = vpack.c.bf16 %v290_v51, %v288_v50  ;;  %v970_v55 = vpack.c.bf16 %v295_v53, %v293_v52  ;;  %v292_v56 = vld [vmem:[#allocation7 + $0x160] sm:$0xff]  ;;  %v294_v57 = vld [vmem:[#allocation7 + $0x170] sm:$0xff]  ;;  %v297_v58 = vld [vmem:[#allocation7 + $0x188] sm:$0xff] }
  0x89   :  { %921 = vmatpush1.bf16.msra.mxu0 %v920_v7  ;;  %947 = vmatprep.subr.bf16.mxu1 %v946_v18  ;;  %v299_v59 = vld [vmem:[#allocation7 + $0x198] sm:$0xff]  ;;  %v972_v60 = vpack.c.bf16 %v294_v57, %v292_v56  ;;  %v296_v62 = vld [vmem:[#allocation7 + $0x180] sm:$0xff]  ;;  %v298_v63 = vld [vmem:[#allocation7 + $0x190] sm:$0xff] }
  0x8a   :  { %923 = vmatprep.subr.bf16.mxu0 %v922_v12  ;;  %v974_v61 = vpack.c.bf16 %v299_v59, %v297_v58  ;;  %v301_v1 = vld [vmem:[#allocation7 + $0x1a8] sm:$0xff]  ;;  %v303_v2 = vld [vmem:[#allocation7 + $0x1b8] sm:$0xff]  ;;  %v976_v3 = vpack.c.bf16 %v298_v63, %v296_v62  ;;  %v300_v5 = vld [vmem:[#allocation7 + $0x1a0] sm:$0xff] }
  0x8b   :  { %v978_v4 = vpack.c.bf16 %v303_v2, %v301_v1  ;;  %v302_v6 = vld [vmem:[#allocation7 + $0x1b0] sm:$0xff]  ;;  %v305_v7 = vld [vmem:[#allocation7 + $0x1c8] sm:$0xff]  ;;  %v307_v8 = vld [vmem:[#allocation7 + $0x1d8] sm:$0xff] }
  0x8c   :  { %949 = vmatpush1.bf16.msra.mxu1 %v948_v23  ;;  %v980_v9 = vpack.c.bf16 %v302_v6, %v300_v5  ;;  %v982_v10 = vpack.c.bf16 %v307_v8, %v305_v7  ;;  %v304_v11 = vld [vmem:[#allocation7 + $0x1c0] sm:$0xff]  ;;  %v306_v12 = vld [vmem:[#allocation7 + $0x1d0] sm:$0xff]  ;;  %v309_v14 = vld [vmem:[#allocation7 + $0x1e8] sm:$0xff] }
  0x8d   :  { %925 = vmatpush1.bf16.msra.mxu0 %v924_v17  ;;  %951 = vmatprep.subr.bf16.mxu1 %v950_v25  ;;  %v984_v13 = vpack.c.bf16 %v306_v12, %v304_v11  ;;  %v311_v15 = vld [vmem:[#allocation7 + $0x1f8] sm:$0xff]  ;;  %v308_v17 = vld [vmem:[#allocation7 + $0x1e0] sm:$0xff]  ;;  %v310_v18 = vld [vmem:[#allocation7 + $0x1f0] sm:$0xff] }
  0x8e   :  { %v986_v16 = vpack.c.bf16 %v311_v15, %v309_v14  ;;  %v988_v19 = vpack.c.bf16 %v310_v18, %v308_v17  ;;  %v406_v20 = vld [vmem:[#allocation8 + $0x8] sm:$0xff]  ;;  %v408_v21 = vld [vmem:[#allocation8 + $0x18] sm:$0xff]  ;;  %v405_v22 = vld [vmem:[#allocation8] sm:$0xff] }
  0x8f   :  { %v990_v23 = vpack.c.bf16 %v408_v21, %v406_v20  ;;  %v410_v25 = vld [vmem:[#allocation8 + $0x28] sm:$0xff]  ;;  %v412_v26 = vld [vmem:[#allocation8 + $0x38] sm:$0xff]  ;;  %v409_v29 = vld [vmem:[#allocation8 + $0x20] sm:$0xff] }
  0x90   :  { %232 = vmatmul.mubr.f32.vlgmr.msra.gmra.mrb[0].mxu0 %v121_v24  ;;  %953 = vmatpush1.bf16.msra.mxu1 %v952_v30  ;;  %v407_v24 = vld [vmem:[#allocation8 + $0x10] sm:$0xff]  ;;  %v994_v28 = vpack.c.bf16 %v412_v26, %v410_v25  ;;  %v413_v35 = vld [vmem:[#allocation8 + $0x40] sm:$0xff]  ;;  %v446_v15 = vld [vmem:[#allocation8 + $0x148] sm:$0xff] }
  0x91   :  { %237 = vmatprep.mubr.f32.mxu0 %v1336_v0  ;;  %955 = vmatprep.subr.bf16.mxu1 %v954_v32  ;;  %v962_v0 = vpack.c.bf16 %v287_v42, %v285_v41  ;;  %v992_v27 = vpack.c.bf16 %v407_v24, %v405_v22  ;;  %v411_v30 = vld [vmem:[#allocation8 + $0x30] sm:$0xff]  ;;  %v416_v32 = vld [vmem:[#allocation8 + $0x58] sm:$0xff]  ;;  %v417_v41 = vld [vmem:[#allocation8 + $0x60] sm:$0xff] }
  0x92   :  { %991 = vmatprep.subr.bf16.mxu0 %v990_v23  ;;  %v996_v33 = vpack.c.bf16 %v411_v30, %v409_v29  ;;  %v415_v36 = vld [vmem:[#allocation8 + $0x50] sm:$0xff]  ;;  %v421_v46 = vld [vmem:[#allocation8 + $0x80] sm:$0xff]  ;;  %v450_v21 = vld [vmem:[#allocation8 + $0x168] sm:$0xff] }
  0x93   :  { %993 = vmatpush1.bf16.msra.mxu0 %v992_v27  ;;  %v1000_v39 = vpack.c.bf16 %v415_v36, %v413_v35  ;;  %v419_v42 = vld [vmem:[#allocation8 + $0x70] sm:$0xff]  ;;  %v425_v52 = vld [vmem:[#allocation8 + $0xa0] sm:$0xff]  ;;  %v452_v22 = vld [vmem:[#allocation8 + $0x178] sm:$0xff] }
  0x94   :  { %238 = vmatmul.mubr.f32.gmra.mrb[2].mxu0 %v122_v31  ;;  %957 = vmatpush1.bf16.msra.mxu1 %v956_v37  ;;  %v414_v31 = vld [vmem:[#allocation8 + $0x48] sm:$0xff]  ;;  %v1004_v44 = vpack.c.bf16 %v419_v42, %v417_v41  ;;  %v423_v47 = vld [vmem:[#allocation8 + $0x90] sm:$0xff]  ;;  %v429_v58 = vld [vmem:[#allocation8 + $0xc0] sm:$0xff]  ;;  %v1034_v24 = vpack.c.bf16 %v452_v22, %v450_v21 }
  0x95   :  { %959 = vmatprep.subr.bf16.mxu1 %v958_v38  ;;  %995 = vmatprep.subr.bf16.mxu0 %v994_v28  ;;  %v998_v34 = vpack.c.bf16 %v416_v32, %v414_v31  ;;  %v418_v37 = vld [vmem:[#allocation8 + $0x68] sm:$0xff]  ;;  %v420_v38 = vld [vmem:[#allocation8 + $0x78] sm:$0xff]  ;;  %v1008_v50 = vpack.c.bf16 %v423_v47, %v421_v46  ;;  %v427_v53 = vld [vmem:[#allocation8 + $0xb0] sm:$0xff] }
  0x96   :  { %v1002_v40 = vpack.c.bf16 %v420_v38, %v418_v37  ;;  %v1012_v56 = vpack.c.bf16 %v427_v53, %v425_v52  ;;  %v431_v59 = vld [vmem:[#allocation8 + $0xd0] sm:$0xff]  ;;  %v433_v1 = vld [vmem:[#allocation8 + $0xe0] sm:$0xff]  ;;  %v454_v27 = vld [vmem:[#allocation8 + $0x188] sm:$0xff] }
  0x97   :  { %997 = vmatpush1.bf16.msra.mxu0 %v996_v33  ;;  %v1016_v62 = vpack.c.bf16 %v431_v59, %v429_v58  ;;  %v435_v2 = vld [vmem:[#allocation8 + $0xf0] sm:$0xff]  ;;  %v437_v7 = vld [vmem:[#allocation8 + $0x100] sm:$0xff]  ;;  %v456_v28 = vld [vmem:[#allocation8 + $0x198] sm:$0xff] }
  0x98   :  { %961 = vmatpush1.bf16.msra.mxu1 %v960_v43  ;;  %999 = vmatprep.subr.bf16.mxu0 %v998_v34  ;;  %v422_v43 = vld [vmem:[#allocation8 + $0x88] sm:$0xff]  ;;  %v1020_v5 = vpack.c.bf16 %v435_v2, %v433_v1  ;;  %v439_v8 = vld [vmem:[#allocation8 + $0x110] sm:$0xff]  ;;  %v449_v25 = vld [vmem:[#allocation8 + $0x160] sm:$0xff]  ;;  %v1038_v30 = vpack.c.bf16 %v456_v28, %v454_v27 }
  0x99   :  { %963 = vmatprep.subr.bf16.mxu1 %v962_v0  ;;  %v424_v0 = vld [vmem:[#allocation8 + $0x98] sm:$0xff]  ;;  %v1024_v11 = vpack.c.bf16 %v439_v8, %v437_v7  ;;  %v443_v14 = vld [vmem:[#allocation8 + $0x130] sm:$0xff]  ;;  %v453_v31 = vld [vmem:[#allocation8 + $0x180] sm:$0xff] }
  0x9a   :  { %v1006_v45 = vpack.c.bf16 %v424_v0, %v422_v43  ;;  %v447_v20 = vld [vmem:[#allocation8 + $0x150] sm:$0xff]  ;;  %v458_v33 = vld [vmem:[#allocation8 + $0x1a8] sm:$0xff]  ;;  %v460_v34 = vld [vmem:[#allocation8 + $0x1b8] sm:$0xff]  ;;  %v157_v43 = vlaneseq }
  0x9b   :  { %1001 = vmatpush1.bf16.msra.mxu0 %v1000_v39  ;;  %v451_v26 = vld [vmem:[#allocation8 + $0x170] sm:$0xff]  ;;  %v1042_v36 = vpack.c.bf16 %v460_v34, %v458_v33  ;;  %v457_v37 = vld [vmem:[#allocation8 + $0x1a0] sm:$0xff]  ;;  %v462_v39 = vld [vmem:[#allocation8 + $0x1c8] sm:$0xff] }
  0x9c   :  { %965 = vmatpush1.bf16.msra.mxu1 %v964_v48  ;;  %1003 = vmatprep.subr.bf16.mxu0 %v1002_v40  ;;  %v426_v48 = vld [vmem:[#allocation8 + $0xa8] sm:$0xff]  ;;  %v1036_v29 = vpack.c.bf16 %v451_v26, %v449_v25  ;;  %v455_v32 = vld [vmem:[#allocation8 + $0x190] sm:$0xff]  ;;  %v464_v40 = vld [vmem:[#allocation8 + $0x1d8] sm:$0xff]  ;;  %v158_v0 = vshrl.u32 %v157_v43, 7 }
  0x9d   :  { %967 = vmatprep.subr.bf16.mxu1 %v966_v49  ;;  %v428_v49 = vld [vmem:[#allocation8 + $0xb8] sm:$0xff]  ;;  %v1040_v35 = vpack.c.bf16 %v455_v32, %v453_v31  ;;  %v459_v38 = vld [vmem:[#allocation8 + $0x1b0] sm:$0xff]  ;;  %v1046_v42 = vpack.c.bf16 %v464_v40, %v462_v39  ;;  %v466_v1 = vld [vmem:[#allocation8 + $0x1e8] sm:$0xff] }
  0x9e   :  { %v1010_v51 = vpack.c.bf16 %v428_v49, %v426_v48  ;;  %v1044_v41 = vpack.c.bf16 %v459_v38, %v457_v37  ;;  %v1495_v46 = vsub.s32 1, %v158_v0  ;;  %v468_v2 = vld [vmem:[#allocation8 + $0x1f8] sm:$0xff]  ;;  %v563_v7 = vld [vmem:[#allocation10 + $0x8] sm:$0xff]  ;;  %v570_v22 = vld [vmem:[#allocation10 + $0x40] sm:$0xff] }
  0x9f   :  { %1005 = vmatpush1.bf16.msra.mxu0 %v1004_v44  ;;  %v1490_v44 = vsub.s32 0, %v158_v0  ;;  %v565_v8 = vld [vmem:[#allocation10 + $0x18] sm:$0xff]  ;;  %v574_v28 = vld [vmem:[#allocation10 + $0x60] sm:$0xff] }
  0xa0   :  { %969 = vmatpush1.bf16.msra.mxu1 %v968_v54  ;;  %1007 = vmatprep.subr.bf16.mxu0 %v1006_v45  ;;  %v430_v54 = vld [vmem:[#allocation8 + $0xc8] sm:$0xff]  ;;  %v155_v45 = vld [vmem:[%s1534_s2] sm:$0x3]  ;;  %v577_v25 = vld [vmem:[#allocation10 + $0x78] sm:$0xff] }
  0xa1   :  { %971 = vmatprep.subr.bf16.mxu1 %v970_v55  ;;  %v432_v55 = vld [vmem:[#allocation8 + $0xd8] sm:$0xff]  ;;  %v160_v47 = vrot.slane %v155_v45, %v1490_v44  ;;  %v164_v48 = vrot.slane %v155_v45, %v1495_v46  ;;  %v578_v34 = vld [vmem:[#allocation10 + $0x80] sm:$0xff] }
  0xa2   :  { %v1014_v57 = vpack.c.bf16 %v432_v55, %v430_v54  ;;  %v581_v31 = vld [vmem:[#allocation10 + $0x98] sm:$0xff]  ;;  %v582_v40 = vld [vmem:[#allocation10 + $0xa0] sm:$0xff] }
  0xa3   :  { %1009 = vmatpush1.bf16.msra.mxu0 %v1008_v50  ;;  %v585_v37 = vld [vmem:[#allocation10 + $0xb8] sm:$0xff] }
  0xa4   :  { %973 = vmatpush1.bf16.msra.mxu1 %v972_v60  ;;  %1011 = vmatprep.subr.bf16.mxu0 %v1010_v51  ;;  %v434_v60 = vld [vmem:[#allocation8 + $0xe8] sm:$0xff]  ;;  %v589_v43 = vld [vmem:[#allocation10 + $0xd8] sm:$0xff] }
  0xa5   :  { %975 = vmatprep.subr.bf16.mxu1 %v974_v61  ;;  %v436_v61 = vld [vmem:[#allocation8 + $0xf8] sm:$0xff] }
  0xa6   :  { %v1018_v63 = vpack.c.bf16 %v436_v61, %v434_v60  ;;  %v461_v61 = vld [vmem:[#allocation8 + $0x1c0] sm:$0xff] }
  0xa7   :  { %1013 = vmatpush1.bf16.msra.mxu0 %v1012_v56 }
  0xa8   :  { %977 = vmatpush1.bf16.msra.mxu1 %v976_v3  ;;  %1015 = vmatprep.subr.bf16.mxu0 %v1014_v57  ;;  %v438_v3 = vld [vmem:[#allocation8 + $0x108] sm:$0xff] }
  0xa9   :  { %979 = vmatprep.subr.bf16.mxu1 %v978_v4  ;;  %v440_v4 = vld [vmem:[#allocation8 + $0x118] sm:$0xff] }
  0xaa   :  { %v1022_v6 = vpack.c.bf16 %v440_v4, %v438_v3  ;;  %v1050_v3 = vpack.c.bf16 %v468_v2, %v466_v1  ;;  %v465_v4 = vld [vmem:[#allocation8 + $0x1e0] sm:$0xff] }
  0xab   :  { %1017 = vmatpush1.bf16.msra.mxu0 %v1016_v62  ;;  %v463_v62 = vld [vmem:[#allocation8 + $0x1d0] sm:$0xff]  ;;  %v598_v2 = vld [vmem:[#allocation10 + $0x120] sm:$0xff] }
  0xac   :  { %981 = vmatpush1.bf16.msra.mxu1 %v980_v9  ;;  %1019 = vmatprep.subr.bf16.mxu0 %v1018_v63  ;;  %v442_v9 = vld [vmem:[#allocation8 + $0x128] sm:$0xff]  ;;  %v1048_v63 = vpack.c.bf16 %v463_v62, %v461_v61  ;;  %v601_v62 = vld [vmem:[#allocation10 + $0x138] sm:$0xff] }
  0xad   :  { %983 = vmatprep.subr.bf16.mxu1 %v982_v10  ;;  %v444_v10 = vld [vmem:[#allocation8 + $0x138] sm:$0xff]  ;;  %v599_v61 = vld [vmem:[#allocation10 + $0x128] sm:$0xff] }
  0xae   :  { %v1026_v12 = vpack.c.bf16 %v444_v10, %v442_v9  ;;  %v562_v9 = vld [vmem:[#allocation10] sm:$0xff]  ;;  %v1054_v10 = vpack.c.bf16 %v565_v8, %v563_v7  ;;  %v1090_v1 = vpack.c.bf16 %v601_v62, %v599_v61  ;;  %v720_v61 = vld [vmem:[#allocation11 + $0x8] sm:$0xff]  ;;  %v737_v62 = vld [vmem:[#allocation11 + $0x90] sm:$0xff] }
  0xaf   :  { %1021 = vmatpush1.bf16.msra.mxu0 %v1020_v5  ;;  %v467_v5 = vld [vmem:[#allocation8 + $0x1f0] sm:$0xff]  ;;  %v602_v8 = vld [vmem:[#allocation10 + $0x140] sm:$0xff] }
  0xb0   :  { %985 = vmatpush1.bf16.msra.mxu1 %v984_v13  ;;  %1023 = vmatprep.subr.bf16.mxu0 %v1022_v6  ;;  %v441_v13 = vld [vmem:[#allocation8 + $0x120] sm:$0xff]  ;;  %v1052_v6 = vpack.c.bf16 %v467_v5, %v465_v4  ;;  %v603_v4 = vld [vmem:[#allocation10 + $0x148] sm:$0xff]  ;;  %v605_v5 = vld [vmem:[#allocation10 + $0x158] sm:$0xff] }
  0xb1   :  { %987 = vmatprep.subr.bf16.mxu1 %v986_v16  ;;  %v448_v16 = vld [vmem:[#allocation8 + $0x158] sm:$0xff]  ;;  %v1028_v17 = vpack.c.bf16 %v443_v14, %v441_v13  ;;  %v1094_v7 = vpack.c.bf16 %v605_v5, %v603_v4  ;;  %v739_v5 = vld [vmem:[#allocation11 + $0xa0] sm:$0xff] }
  0xb2   :  { %v1030_v18 = vpack.c.bf16 %v448_v16, %v446_v15  ;;  %v569_v13 = vld [vmem:[#allocation10 + $0x38] sm:$0xff]  ;;  %v566_v16 = vld [vmem:[#allocation10 + $0x20] sm:$0xff] }
  0xb3   :  { %1025 = vmatpush1.bf16.msra.mxu0 %v1024_v11  ;;  %v564_v11 = vld [vmem:[#allocation10 + $0x10] sm:$0xff]  ;;  %v722_v4 = vld [vmem:[#allocation11 + $0x18] sm:$0xff] }
  0xb4   :  { %989 = vmatpush1.bf16.msra.mxu1 %v988_v19  ;;  %1027 = vmatprep.subr.bf16.mxu0 %v1026_v12  ;;  %v445_v19 = vld [vmem:[#allocation8 + $0x140] sm:$0xff]  ;;  %v567_v12 = vld [vmem:[#allocation10 + $0x28] sm:$0xff]  ;;  %v1056_v14 = vpack.c.bf16 %v564_v11, %v562_v9  ;;  %v604_v9 = vld [vmem:[#allocation10 + $0x150] sm:$0xff] }
  0xb5   :  { %v1032_v23 = vpack.c.bf16 %v447_v20, %v445_v19  ;;  %v1058_v15 = vpack.c.bf16 %v569_v13, %v567_v12  ;;  %1055 = vmatprep.subr.bf16.mxu1 %v1054_v10  ;;  %v573_v19 = vld [vmem:[#allocation10 + $0x58] sm:$0xff]  ;;  %v607_v10 = vld [vmem:[#allocation10 + $0x168] sm:$0xff]  ;;  %v1096_v12 = vpack.c.bf16 %v604_v9, %v602_v8  ;;  %v723_v9 = vld [vmem:[#allocation11 + $0x20] sm:$0xff] }
  0xb6   :  { %v609_v11 = vld [vmem:[#allocation10 + $0x178] sm:$0xff] }
  0xb7   :  { %1029 = vmatpush1.bf16.msra.mxu0 %v1028_v17  ;;  %v568_v17 = vld [vmem:[#allocation10 + $0x30] sm:$0xff]  ;;  %v1098_v13 = vpack.c.bf16 %v609_v11, %v607_v10  ;;  %v724_v10 = vld [vmem:[#allocation11 + $0x28] sm:$0xff] }
  0xb8   :  { %1031 = vmatprep.subr.bf16.mxu0 %v1030_v18  ;;  %v571_v18 = vld [vmem:[#allocation10 + $0x48] sm:$0xff]  ;;  %v1060_v20 = vpack.c.bf16 %v568_v17, %v566_v16  ;;  %v613_v17 = vld [vmem:[#allocation10 + $0x198] sm:$0xff]  ;;  %v741_v11 = vld [vmem:[#allocation11 + $0xb0] sm:$0xff] }
  0xb9   :  { %v1062_v21 = vpack.c.bf16 %v573_v19, %v571_v18  ;;  %v611_v16 = vld [vmem:[#allocation10 + $0x188] sm:$0xff] }
  0xba   :  { %v1102_v19 = vpack.c.bf16 %v613_v17, %v611_v16  ;;  %v726_v16 = vld [vmem:[#allocation11 + $0x38] sm:$0xff]  ;;  %v743_v17 = vld [vmem:[#allocation11 + $0xc0] sm:$0xff] }
  0xbb   :  { %1033 = vmatpush1.bf16.msra.mxu0 %v1032_v23  ;;  %v572_v23 = vld [vmem:[#allocation10 + $0x50] sm:$0xff] }
  0xbc   :  { %1035 = vmatprep.subr.bf16.mxu0 %v1034_v24  ;;  %v575_v24 = vld [vmem:[#allocation10 + $0x68] sm:$0xff]  ;;  %v1064_v26 = vpack.c.bf16 %v572_v23, %v570_v22  ;;  %v617_v23 = vld [vmem:[#allocation10 + $0x1b8] sm:$0xff] }
  0xbd   :  { %v1066_v27 = vpack.c.bf16 %v577_v25, %v575_v24  ;;  %v615_v22 = vld [vmem:[#allocation10 + $0x1a8] sm:$0xff] }
  0xbe   :  { %v1106_v25 = vpack.c.bf16 %v617_v23, %v615_v22  ;;  %v728_v22 = vld [vmem:[#allocation11 + $0x48] sm:$0xff]  ;;  %v745_v23 = vld [vmem:[#allocation11 + $0xd0] sm:$0xff] }
  0xbf   :  { %1037 = vmatpush1.bf16.msra.mxu0 %v1036_v29  ;;  %v576_v29 = vld [vmem:[#allocation10 + $0x70] sm:$0xff] }
  0xc0   :  { %1039 = vmatprep.subr.bf16.mxu0 %v1038_v30  ;;  %v579_v30 = vld [vmem:[#allocation10 + $0x88] sm:$0xff]  ;;  %v1068_v32 = vpack.c.bf16 %v576_v29, %v574_v28  ;;  %v621_v29 = vld [vmem:[#allocation10 + $0x1d8] sm:$0xff] }
  0xc1   :  { %v1070_v33 = vpack.c.bf16 %v581_v31, %v579_v30  ;;  %v619_v28 = vld [vmem:[#allocation10 + $0x1c8] sm:$0xff] }
  0xc2   :  { %v1110_v31 = vpack.c.bf16 %v621_v29, %v619_v28  ;;  %v730_v28 = vld [vmem:[#allocation11 + $0x58] sm:$0xff]  ;;  %v747_v29 = vld [vmem:[#allocation11 + $0xe0] sm:$0xff] }
  0xc3   :  { %1041 = vmatpush1.bf16.msra.mxu0 %v1040_v35  ;;  %v580_v35 = vld [vmem:[#allocation10 + $0x90] sm:$0xff] }
  0xc4   :  { %1043 = vmatprep.subr.bf16.mxu0 %v1042_v36  ;;  %v583_v36 = vld [vmem:[#allocation10 + $0xa8] sm:$0xff]  ;;  %v1072_v38 = vpack.c.bf16 %v580_v35, %v578_v34 }
  0xc5   :  { %v1074_v39 = vpack.c.bf16 %v585_v37, %v583_v36 }
  0xc7   :  { %1045 = vmatpush1.bf16.msra.mxu0 %v1044_v41  ;;  %v584_v41 = vld [vmem:[#allocation10 + $0xb0] sm:$0xff] }
  0xc8   :  { %1047 = vmatprep.subr.bf16.mxu0 %v1046_v42  ;;  %v587_v42 = vld [vmem:[#allocation10 + $0xc8] sm:$0xff]  ;;  %v1076_v0 = vpack.c.bf16 %v584_v41, %v582_v40 }
  0xc9   :  { %v1078_v45 = vpack.c.bf16 %v589_v43, %v587_v42 }
  0xcb   :  { %1049 = vmatpush1.bf16.msra.mxu0 %v1048_v63 }
  0xcc   :  { %1051 = vmatprep.subr.bf16.mxu0 %v1050_v3  ;;  %v600_v3 = vld [vmem:[#allocation10 + $0x130] sm:$0xff] }
  0xcf   :  { %1053 = vmatpush1.bf16.msra.mxu0 %v1052_v6  ;;  %v1092_v6 = vpack.c.bf16 %v600_v3, %v598_v2  ;;  %v721_v3 = vld [vmem:[#allocation11 + $0x10] sm:$0xff] }
 0x163   :  { %v233_v49 = vpop.f32.mrb[0].mxu0 }
 0x164   :  { %v234_v50 = vadd.f32 %v233_v49, %v160_v47  ;;  %v235_v51 = vpop.f32.mrb[1].mxu0  ;;  %v591_v49 = vld [vmem:[#allocation10 + $0xe8] sm:$0xff] }
 0x165   :  { %v236_v52 = vadd.f32 %v235_v51, %v164_v48 }
 0x166   :  { %v244_v55 = vmax.f32 %v234_v50, 0.0  ;;  %v593_v50 = vld [vmem:[#allocation10 + $0xf8] sm:$0xff] }
 0x167   :  { %v239_v53 = vpop.f32.mrb[2].mxu0  ;;  %v245_v54 = vmax.f32 %v236_v52, 0.0  ;;  %v1082_v52 = vpack.c.bf16 %v593_v50, %v591_v49  ;;  %v620_v49 = vld [vmem:[#allocation10 + $0x1d0] sm:$0xff] }
 0x168   :  { %v240_v56 = vadd.f32 %v239_v53, %v160_v47  ;;  %v241_v57 = vpop.f32.mrb[3].mxu0  ;;  %v586_v47 = vld [vmem:[#allocation10 + $0xc0] sm:$0xff] }
 0x169   :  { %v242_v58 = vadd.f32 %v241_v57, %v164_v48  ;;  %388 = vmatprep.mubr.f32.mxu1 %v245_v54  ;;  %v588_v48 = vld [vmem:[#allocation10 + $0xd0] sm:$0xff]  ;;  %v590_v53 = vld [vmem:[#allocation10 + $0xe0] sm:$0xff] }
 0x16a   :  { %389 = vmatmul.mubr.f32.vlgmr.msra.gmra.mrb[0].mxu1 %v244_v55  ;;  %v246_v60 = vmax.f32 %v240_v56, 0.0  ;;  %v1080_v51 = vpack.c.bf16 %v588_v48, %v586_v47  ;;  %v592_v54 = vld [vmem:[#allocation10 + $0xf0] sm:$0xff]  ;;  %v595_v55 = vld [vmem:[#allocation10 + $0x108] sm:$0xff]  ;;  %v597_v56 = vld [vmem:[#allocation10 + $0x118] sm:$0xff] }
 0x16b   :  { %v247_v59 = vmax.f32 %v242_v58, 0.0  ;;  %1057 = vmatpush1.bf16.msra.mxu1 %v1056_v14  ;;  %v1084_v57 = vpack.c.bf16 %v592_v54, %v590_v53  ;;  %v1086_v58 = vpack.c.bf16 %v597_v56, %v595_v55  ;;  %v606_v14 = vld [vmem:[#allocation10 + $0x160] sm:$0xff]  ;;  %v624_v55 = vld [vmem:[#allocation10 + $0x1f0] sm:$0xff] }
 0x16c   :  { %1059 = vmatprep.subr.bf16.mxu1 %v1058_v15  ;;  %v608_v15 = vld [vmem:[#allocation10 + $0x170] sm:$0xff]  ;;  %v618_v48 = vld [vmem:[#allocation10 + $0x1c0] sm:$0xff] }
 0x16d   :  { %394 = vmatprep.mubr.f32.mxu1 %v247_v59  ;;  %v594_v59 = vld [vmem:[#allocation10 + $0x100] sm:$0xff]  ;;  %v1100_v18 = vpack.c.bf16 %v608_v15, %v606_v14  ;;  %v1112_v50 = vpack.c.bf16 %v620_v49, %v618_v48  ;;  %v725_v15 = vld [vmem:[#allocation11 + $0x30] sm:$0xff] }
 0x16e   :  { %395 = vmatmul.mubr.f32.gmra.mrb[2].mxu1 %v246_v60  ;;  %v596_v60 = vld [vmem:[#allocation10 + $0x110] sm:$0xff]  ;;  %v622_v54 = vld [vmem:[#allocation10 + $0x1e0] sm:$0xff] }
 0x16f   :  { %1061 = vmatpush1.bf16.msra.mxu1 %v1060_v20  ;;  %v1088_v63 = vpack.c.bf16 %v596_v60, %v594_v59  ;;  %v610_v20 = vld [vmem:[#allocation10 + $0x180] sm:$0xff]  ;;  %v1116_v56 = vpack.c.bf16 %v624_v55, %v622_v54  ;;  %v733_v55 = vld [vmem:[#allocation11 + $0x70] sm:$0xff] }
 0x170   :  { %1063 = vmatprep.subr.bf16.mxu1 %v1062_v21  ;;  %v612_v21 = vld [vmem:[#allocation10 + $0x190] sm:$0xff]  ;;  %v719_v59 = vld [vmem:[#allocation11] sm:$0xff] }
 0x171   :  { %v1104_v24 = vpack.c.bf16 %v612_v21, %v610_v20  ;;  %v727_v21 = vld [vmem:[#allocation11 + $0x40] sm:$0xff] }
 0x172   :  { %v731_v49 = vld [vmem:[#allocation11 + $0x60] sm:$0xff] }
 0x173   :  { %1065 = vmatpush1.bf16.msra.mxu1 %v1064_v26  ;;  %v614_v26 = vld [vmem:[#allocation10 + $0x1a0] sm:$0xff] }
 0x174   :  { %1067 = vmatprep.subr.bf16.mxu1 %v1066_v27  ;;  %v616_v27 = vld [vmem:[#allocation10 + $0x1b0] sm:$0xff] }
 0x175   :  { %v1108_v30 = vpack.c.bf16 %v616_v27, %v614_v26  ;;  %v729_v27 = vld [vmem:[#allocation11 + $0x50] sm:$0xff] }
 0x177   :  { %1069 = vmatpush1.bf16.msra.mxu1 %v1068_v32  ;;  %v312_v32 = vld [vmem:[%s1536_s4] sm:$0x3] }
 0x178   :  { %1071 = vmatprep.subr.bf16.mxu1 %v1070_v33  ;;  %v317_v33 = vrot.slane %v312_v32, %v1490_v44  ;;  %v321_v34 = vrot.slane %v312_v32, %v1495_v46 }
 0x17b   :  { %1073 = vmatpush1.bf16.msra.mxu1 %v1072_v38 }
 0x17c   :  { %1075 = vmatprep.subr.bf16.mxu1 %v1074_v39 }
 0x17f   :  { %1077 = vmatpush1.bf16.msra.mxu1 %v1076_v0 }
 0x180   :  { %1079 = vmatprep.subr.bf16.mxu1 %v1078_v45 }
 0x183   :  { %1081 = vmatpush1.bf16.msra.mxu1 %v1080_v51  ;;  %v623_v51 = vld [vmem:[#allocation10 + $0x1e8] sm:$0xff] }
 0x184   :  { %1083 = vmatprep.subr.bf16.mxu1 %v1082_v52  ;;  %v625_v52 = vld [vmem:[#allocation10 + $0x1f8] sm:$0xff] }
 0x185   :  { %v1114_v53 = vpack.c.bf16 %v625_v52, %v623_v51  ;;  %v749_v52 = vld [vmem:[#allocation11 + $0xf0] sm:$0xff] }
 0x187   :  { %1085 = vmatpush1.bf16.msra.mxu1 %v1084_v57  ;;  %v735_v57 = vld [vmem:[#allocation11 + $0x80] sm:$0xff] }
 0x188   :  { %1087 = vmatprep.subr.bf16.mxu1 %v1086_v58  ;;  %v736_v58 = vld [vmem:[#allocation11 + $0x88] sm:$0xff] }
 0x189   :  { %v1118_v60 = vpack.c.bf16 %v736_v58, %v735_v57  ;;  %v626_v58 = vld [vmem:[%s1540_s8] sm:$0x3] }
 0x18b   :  { %1089 = vmatpush1.bf16.msra.mxu1 %v1088_v63  ;;  %v738_v63 = vld [vmem:[#allocation11 + $0x98] sm:$0xff]  ;;  %1119 = vmatprep.subr.bf16.mxu0 %v1118_v60  ;;  %v635_v60 = vrot.slane %v626_v58, %v1495_v46 }
 0x18c   :  { %1091 = vmatprep.subr.bf16.mxu1 %v1090_v1  ;;  %v1120_v1 = vpack.c.bf16 %v720_v61, %v719_v59  ;;  %v1122_v2 = vpack.c.bf16 %v738_v63, %v737_v62  ;;  %v631_v59 = vrot.slane %v626_v58, %v1490_v44 }
 0x18f   :  { %1093 = vmatpush1.bf16.msra.mxu1 %v1092_v6  ;;  %v740_v6 = vld [vmem:[#allocation11 + $0xa8] sm:$0xff] }
 0x190   :  { %1095 = vmatprep.subr.bf16.mxu1 %v1094_v7  ;;  %v1124_v7 = vpack.c.bf16 %v722_v4, %v721_v3  ;;  %v1126_v8 = vpack.c.bf16 %v740_v6, %v739_v5 }
 0x193   :  { %1097 = vmatpush1.bf16.msra.mxu1 %v1096_v12  ;;  %v742_v12 = vld [vmem:[#allocation11 + $0xb8] sm:$0xff] }
 0x194   :  { %1099 = vmatprep.subr.bf16.mxu1 %v1098_v13  ;;  %v1128_v13 = vpack.c.bf16 %v724_v10, %v723_v9  ;;  %v1130_v14 = vpack.c.bf16 %v742_v12, %v741_v11 }
 0x197   :  { %1101 = vmatpush1.bf16.msra.mxu1 %v1100_v18  ;;  %v744_v18 = vld [vmem:[#allocation11 + $0xc8] sm:$0xff] }
 0x198   :  { %1103 = vmatprep.subr.bf16.mxu1 %v1102_v19  ;;  %v1132_v19 = vpack.c.bf16 %v726_v16, %v725_v15  ;;  %v1134_v20 = vpack.c.bf16 %v744_v18, %v743_v17 }
 0x19b   :  { %1105 = vmatpush1.bf16.msra.mxu1 %v1104_v24  ;;  %v746_v24 = vld [vmem:[#allocation11 + $0xd8] sm:$0xff] }
 0x19c   :  { %1107 = vmatprep.subr.bf16.mxu1 %v1106_v25  ;;  %v1136_v25 = vpack.c.bf16 %v728_v22, %v727_v21  ;;  %v1138_v26 = vpack.c.bf16 %v746_v24, %v745_v23 }
 0x19f   :  { %1109 = vmatpush1.bf16.msra.mxu1 %v1108_v30  ;;  %v748_v30 = vld [vmem:[#allocation11 + $0xe8] sm:$0xff] }
 0x1a0   :  { %1111 = vmatprep.subr.bf16.mxu1 %v1110_v31  ;;  %v1140_v31 = vpack.c.bf16 %v730_v28, %v729_v27  ;;  %v1142_v32 = vpack.c.bf16 %v748_v30, %v747_v29 }
 0x1a3   :  { %1113 = vmatpush1.bf16.msra.mxu1 %v1112_v50  ;;  %v732_v50 = vld [vmem:[#allocation11 + $0x68] sm:$0xff] }
 0x1a4   :  { %1115 = vmatprep.subr.bf16.mxu1 %v1114_v53  ;;  %v1144_v51 = vpack.c.bf16 %v732_v50, %v731_v49  ;;  %v750_v53 = vld [vmem:[#allocation11 + $0xf8] sm:$0xff] }
 0x1a5   :  { %v1146_v54 = vpack.c.bf16 %v750_v53, %v749_v52 }
 0x1a7   :  { %1117 = vmatpush1.bf16.msra.mxu1 %v1116_v56  ;;  %v734_v56 = vld [vmem:[#allocation11 + $0x78] sm:$0xff] }
 0x1a8   :  { %v1148_v57 = vpack.c.bf16 %v734_v56, %v733_v55 }
 0x23d   :  { %v390_v35 = vpop.f32.mrb[0].mxu1 }
 0x23e   :  { %v391_v36 = vadd.f32 %v390_v35, %v317_v33  ;;  %v392_v37 = vpop.f32.mrb[1].mxu1 }
 0x23f   :  { %v393_v38 = vadd.f32 %v392_v37, %v321_v34 }
 0x240   :  { %v401_v41 = vmax.f32 %v391_v36, 0.0 }
 0x241   :  { %v402_v39 = vmax.f32 %v393_v38, 0.0  ;;  %v396_v40 = vpop.f32.mrb[2].mxu1 }
 0x242   :  { %v397_v42 = vadd.f32 %v396_v40, %v317_v33  ;;  %v398_v43 = vpop.f32.mrb[3].mxu1  ;;  %v469_v33 = vld [vmem:[%s1538_s6] sm:$0x3] }
 0x243   :  { %v399_v0 = vadd.f32 %v398_v43, %v321_v34  ;;  %545 = vmatprep.mubr.f32.mxu0 %v402_v39  ;;  %v474_v34 = vrot.slane %v469_v33, %v1490_v44  ;;  %v478_v35 = vrot.slane %v469_v33, %v1495_v46  ;;  %v855_v44 = vld [vmem:[%s1542_s10] ss:$0 sm:$0xff] }
 0x244   :  { %546 = vmatmul.mubr.f32.vlgmr.msra.gmra.mrb[4].mxu0 %v401_v41  ;;  %v403_v47 = vmax.f32 %v397_v42, 0.0 }
 0x245   :  { %v404_v45 = vmax.f32 %v399_v0, 0.0  ;;  %1121 = vmatpush3.bf16.msra.mxu0 %v1120_v1 }
 0x246   :  { %1123 = vmatprep.subr.bf16.mxu0 %v1122_v2 }
 0x247   :  { %551 = vmatprep.mubr.f32.mxu0 %v404_v45 }
 0x248   :  { %552 = vmatmul.mubr.f32.gmra.mrb[6].mxu0 %v403_v47 }
 0x249   :  { %1125 = vmatpush3.bf16.msra.mxu0 %v1124_v7 }
 0x24a   :  { %1127 = vmatprep.subr.bf16.mxu0 %v1126_v8 }
 0x24d   :  { %1129 = vmatpush3.bf16.msra.mxu0 %v1128_v13 }
 0x24e   :  { %1131 = vmatprep.subr.bf16.mxu0 %v1130_v14 }
 0x251   :  { %1133 = vmatpush3.bf16.msra.mxu0 %v1132_v19 }
 0x252   :  { %1135 = vmatprep.subr.bf16.mxu0 %v1134_v20 }
 0x255   :  { %1137 = vmatpush3.bf16.msra.mxu0 %v1136_v25 }
 0x256   :  { %1139 = vmatprep.subr.bf16.mxu0 %v1138_v26 }
 0x259   :  { %1141 = vmatpush3.bf16.msra.mxu0 %v1140_v31 }
 0x25a   :  { %1143 = vmatprep.subr.bf16.mxu0 %v1142_v32 }
 0x25d   :  { %1145 = vmatpush3.bf16.msra.mxu0 %v1144_v51 }
 0x25e   :  { %1147 = vmatprep.subr.bf16.mxu0 %v1146_v54 }
 0x261   :  { %1149 = vmatpush3.bf16.msra.mxu0 %v1148_v57 }
 0x317   :  { %v547_v36 = vpop.f32.mrb[4].mxu0 }
 0x318   :  { %v548_v37 = vadd.f32 %v547_v36, %v474_v34  ;;  %v549_v38 = vpop.f32.mrb[5].mxu0 }
 0x319   :  { %v550_v39 = vadd.f32 %v549_v38, %v478_v35 }
 0x31a   :  { %v558_v42 = vmax.f32 %v548_v37, 0.0 }
 0x31b   :  { %v559_v40 = vmax.f32 %v550_v39, 0.0  ;;  %v553_v41 = vpop.f32.mrb[6].mxu0 }
 0x31c   :  { %v554_v43 = vadd.f32 %v553_v41, %v474_v34  ;;  %v555_v0 = vpop.f32.mrb[7].mxu0 }
 0x31d   :  { %v556_v45 = vadd.f32 %v555_v0, %v478_v35  ;;  %702 = vmatprep.mubr.f32.mxu1 %v559_v40 }
 0x31e   :  { %703 = vmatmul.mubr.f32.vlgmr.msra.gmra.mrb[4].mxu1 %v558_v42  ;;  %v560_v48 = vmax.f32 %v554_v43, 0.0 }
 0x31f   :  { %v561_v47 = vmax.f32 %v556_v45, 0.0 }
 0x321   :  { %708 = vmatprep.mubr.f32.mxu1 %v561_v47 }
 0x322   :  { %709 = vmatmul.mubr.f32.gmra.mrb[6].mxu1 %v560_v48 }
 0x3f1   :  { %v704_v61 = vpop.f32.mrb[4].mxu1 }
 0x3f2   :  { %v705_v62 = vadd.f32 %v704_v61, %v631_v59  ;;  %v706_v63 = vpop.f32.mrb[5].mxu1 }
 0x3f3   :  { %v707_v1 = vadd.f32 %v706_v63, %v635_v60 }
 0x3f4   :  { %v715_v4 = vmax.f32 %v705_v62, 0.0 }
 0x3f5   :  { %v716_v2 = vmax.f32 %v707_v1, 0.0  ;;  %v710_v3 = vpop.f32.mrb[6].mxu1 }
 0x3f6   :  { %v711_v5 = vadd.f32 %v710_v3, %v631_v59  ;;  %v712_v6 = vpop.f32.mrb[7].mxu1 }
 0x3f7   :  { %v713_v7 = vadd.f32 %v712_v6, %v635_v60  ;;  %822 = vmatprep.mubr.f32.mxu0 %v716_v2 }
 0x3f8   :  { %823 = vmatmul.mubr.f32.vlgmr.msra.gmra.mrb[8].mxu0 %v715_v4  ;;  %v717_v9 = vmax.f32 %v711_v5, 0.0 }
 0x3f9   :  { %v718_v8 = vmax.f32 %v713_v7, 0.0 }
 0x3fb   :  { %827 = vmatprep.mubr.f32.mxu0 %v718_v8 }
 0x3fc   :  { %828 = vmatmul.mubr.f32.gmra.mrb[10].mxu0 %v717_v9 }
 0x4cb   :  { %v888_v10 = vpop.f32.mrb[8].mxu0 }
 0x4cc   :  { %v889_v46 = vpop.f32.mrb[9].mxu0 }
 0x4cd   :  { %v890_v11 = vadd.f32 %v889_v46, %v888_v10 }
 0x4cf   :  { %v825_v12 = vadd.f32 %v890_v11, %v855_v44  ;;  %v891_v13 = vpop.f32.mrb[10].mxu0 }
 0x4d0   :  { %v892_v14 = vpop.f32.mrb[11].mxu0 }
 0x4d1   :  { %833 = vst [vmem:[#allocation13] sm:$0xff] %v825_v12  ;;  %v893_v15 = vadd.f32 %v892_v14, %v891_v13 }
 0x4d3   :  { %v830_v16 = vadd.f32 %v893_v15, %v855_v44 }
 0x4d5   :  { %834 = vst [vmem:[#allocation13 + $0x8] sm:$0xff] %v830_v16 }
 0x4d6   :  { %1305 = shalt.err (!%p1302_p10)
}
 0x4d7   :  { %s1306_s22 = scalar_lea.hbm %s1543_s11, 256 }
 0x4d8   :  { %p1307_p11 = scmp.ne.s32.totalorder %s1543_s11, %s1306_s22  ;;  %p1310_p12 = scmp.lt.u32.totalorder %s1306_s22, %s1543_s11 }
 0x4da   :  { %p1312_p13 = pnand %p1310_p12, %p1307_p11 }
 0x4dc   :  { %1315 = shalt.err (!%p1312_p13)
}
 0x4dd   :  { %846 = dma.vmem_to_hbm [thread:$0]  %s841_s18, 256, %s1543_s11, [#allocation4], %s1331_s5, %s1331_s5, %s1332_s13  }
 0x4de   :  { %1324 = dma.done.wait [#allocation4], 256  }
 0x4df   :  { %1325 = vsyncadd [#allocation4], 4294967040 }
 0x4e0   :  { %850 = vsyncpa [#allocation3], 1 }
 0x4e1   :  { %851 = vsyncpa [#allocation6], 1 }
 0x4e2   :  { %852 = vsyncpa [#allocation9], 1 }
 0x4e3   :  { %853 = vsyncpa [#allocation12], 1 }
 0x4e4   :  { %854 = vsyncpa [#allocation4], 1 }

</bundles_post_ra>
